<compile_context>
chip_gen: v5e
topology: v5e:2x2
jax: 0.10.0
libtpu: 0.0.40
codegen_flags: <defaults>
</compile_context>

<pallas_src>
import functools

import jax
import jax.numpy as jnp
from jax.experimental import pallas as pl
from jax.experimental.pallas import tpu as pltpu


LANE = 128      # lane width   (last dim)
SUBLANE = 8     # sublane rows (second-last dim)


def _round_up(n, m):
    return ((n + m - 1) // m) * m


# ---------------------------------------------------------------------------
# Fused kernel: the whole VBLinear stack in one invocation.
# refs = (x, [w_mu_i, w_s2_i, b_i, eps_i]*n_layers, out)
#   x      : [Bp, D0p]
#   w_mu_i : [Dip, Djp]   (mu_w.T, zero-padded)
#   w_s2_i : [Dip, Djp]   (exp(clamp(logsig2_w)).T, zero-padded)
#   b_i    : [1,  Djp]
#   eps_i  : [Bp, Djp]
# ---------------------------------------------------------------------------
def _bnn_fused_kernel(*refs, n_layers, activation):
    x_ref = refs[0]
    o_ref = refs[-1]

    h = x_ref[...]                                              # [Bp, D0p]
    for i in range(n_layers):
        w_mu_ref, w_s2_ref, b_ref, eps_ref = refs[1 + 4 * i: 5 + 4 * i]

        mu = jnp.dot(h, w_mu_ref[...],
                     preferred_element_type=jnp.float32) + b_ref[...]
        var = jnp.dot(h * h, w_s2_ref[...],
                      preferred_element_type=jnp.float32)
        h = mu + jnp.sqrt(var) * eps_ref[...]

        if i < n_layers - 1:                                    # inner activation only
            if activation == "relu":
                h = jnp.maximum(h, 0.0)
            elif activation == "tanh":
                h = jnp.tanh(h)
            elif activation == "elu":
                h = jnp.where(h > 0.0, h,
                              jnp.exp(jnp.minimum(h, 0.0)) - 1.0)

    o_ref[...] = h.astype(o_ref.dtype)                          # lane-dense store


# ---------------------------------------------------------------------------
# Parameter plumbing (outside the kernel, once per weight set).
# ---------------------------------------------------------------------------
def _pack_layer(mu_w, logsig2_w, bias, eps, n_in_pad, n_out_pad, b_pad):
    n_out, n_in = mu_w.shape
    s2_w = jnp.exp(jnp.clip(logsig2_w, -20.0, 11.0))

    w_mu = jnp.zeros((n_in_pad, n_out_pad), jnp.float32)
    w_mu = w_mu.at[:n_in, :n_out].set(mu_w.T.astype(jnp.float32))
    w_s2 = jnp.zeros((n_in_pad, n_out_pad), jnp.float32)
    w_s2 = w_s2.at[:n_in, :n_out].set(s2_w.T.astype(jnp.float32))

    b = jnp.zeros((1, n_out_pad), jnp.float32).at[:, :n_out].set(bias)
    eps_p = jnp.zeros((b_pad, n_out_pad), jnp.float32)
    eps_p = eps_p.at[:eps.shape[0], :n_out].set(eps)
    return w_mu, w_s2, b, eps_p


def init_bnn_params(key, layer_dims, activation="relu"):
    """Deterministic re-implementation of VBLinear.reset_parameters."""
    params = []
    for n_in, n_out in zip(layer_dims[:-1], layer_dims[1:]):
        key, k_mu, k_ls = jax.random.split(key, 3)
        if activation == "tanh":
            std = jnp.sqrt(2.0 / (n_in + n_out))                # xavier_normal
        else:                                                   # relu / elu -> kaiming fan_in
            std = jnp.sqrt(2.0 / n_in)
        mu_w = std * jax.random.normal(k_mu, (n_out, n_in), jnp.float32)
        logsig2_w = -9.0 + 0.001 * jax.random.normal(k_ls, (n_out, n_in), jnp.float32)
        bias = jnp.zeros((n_out,), jnp.float32)
        params.append((mu_w, logsig2_w, bias))
    return params


# ---------------------------------------------------------------------------
# Forward: BNN_model.forward (slice to input_dim, run the fused stack).
# ---------------------------------------------------------------------------
@functools.partial(jax.jit, static_argnames=("input_dim", "activation"))
def bnn_forward(x_fw, params, noises, input_dim, activation="relu"):
    dims = [input_dim] + [mu_w.shape[0] for (mu_w, _, _) in params]
    pad_dims = [_round_up(d, LANE) for d in dims]
    B = x_fw.shape[0]
    b_pad = _round_up(B, SUBLANE)

    h = x_fw[:, :input_dim]
    x_pad = jnp.zeros((b_pad, pad_dims[0]), jnp.float32)
    x_pad = x_pad.at[:B, :input_dim].set(h.astype(jnp.float32))

    inputs = [x_pad]
    for i, ((mu_w, logsig2_w, bias), eps) in enumerate(zip(params, noises)):
        inputs.extend(_pack_layer(mu_w, logsig2_w, bias, eps,
                                  pad_dims[i], pad_dims[i + 1], b_pad))

    kernel = functools.partial(_bnn_fused_kernel,
                               n_layers=len(params),
                               activation=activation)
    vmem_spec = pl.BlockSpec(memory_space=pltpu.MemorySpace.VMEM)

    out_padded = pl.pallas_call(
        kernel,
        out_shape=jax.ShapeDtypeStruct((b_pad, pad_dims[-1]), jnp.float32),
        in_specs=[vmem_spec] * len(inputs),
        out_specs=vmem_spec,
    )(*inputs)

    return out_padded[:B, :dims[-1]]


# Pure-JAX reference (mirrors the torch training-mode forward) for sanity check.
def bnn_reference(x_fw, params, noises, input_dim, activation="relu"):
    h = x_fw[:, :input_dim]
    n_layers = len(params)
    for i, (mu_w, logsig2_w, bias) in enumerate(params):
        mu_out = h @ mu_w.T + bias
        s2_w = jnp.exp(jnp.clip(logsig2_w, -20.0, 11.0))
        var_out = (h * h) @ s2_w.T
        h = mu_out + jnp.sqrt(var_out) * noises[i]
        if i < n_layers - 1:
            if activation == "relu":
                h = jnp.maximum(h, 0.0)
            elif activation == "tanh":
                h = jnp.tanh(h)
            elif activation == "elu":
                h = jnp.where(h > 0.0, h, jnp.exp(jnp.minimum(h, 0.0)) - 1.0)
    return h


if __name__ == "__main__":
    # BNN_model(net_training_size=100, net_inner_layers=[32, 32],
    #           net_input_dim=4, net_activation_inner="relu")
    INPUT_DIM = 4
    LAYER_DIMS = [INPUT_DIM, 32, 32, 2]     # [input_dim] + inner_layers + [2]
    BATCH = 8

    key = jax.random.PRNGKey(0)
    key, k_x, k_noise = jax.random.split(key, 3)

    # Input has extra features; forward slices to input_dim (x_fw[:, 0:input_dim]).
    x = jax.random.normal(k_x, (BATCH, 6), jnp.float32)

    params = init_bnn_params(key, LAYER_DIMS, activation="relu")

    # Deterministic stand-in for torch.randn_like(mu_out) drawn inside each layer.
    # TODO(synk): could be drawn in-kernel with pltpu.prng_seed/stateful_normal to
    # match fresh-eps-per-forward semantics across repeated calls.
    noises = []
    for n_out in LAYER_DIMS[1:]:
        k_noise, sub = jax.random.split(k_noise)
        noises.append(jax.random.normal(sub, (BATCH, n_out), jnp.float32))

    y = bnn_forward(x, tuple(params), tuple(noises), INPUT_DIM, activation="relu")
    y = jax.block_until_ready(y)

    assert y.shape == (BATCH, 2) and y.dtype == jnp.float32

    y_ref = bnn_reference(x, params, noises, INPUT_DIM, activation="relu")
    assert jnp.allclose(y, y_ref, atol=1e-3, rtol=1e-3), "mismatch vs reference"

    print("KERNEL_OK")
</pallas_src>

<mosaic_0001>
module attributes {stable_mosaic.version = 11 : i64} {
  func.func @_bnn_fused_kernel(%arg0: memref<8x128xf32, #tpu.memory_space<vmem>>, %arg1: memref<128x128xf32, #tpu.memory_space<vmem>>, %arg2: memref<128x128xf32, #tpu.memory_space<vmem>>, %arg3: memref<1x128xf32, #tpu.memory_space<vmem>>, %arg4: memref<8x128xf32, #tpu.memory_space<vmem>>, %arg5: memref<128x128xf32, #tpu.memory_space<vmem>>, %arg6: memref<128x128xf32, #tpu.memory_space<vmem>>, %arg7: memref<1x128xf32, #tpu.memory_space<vmem>>, %arg8: memref<8x128xf32, #tpu.memory_space<vmem>>, %arg9: memref<128x128xf32, #tpu.memory_space<vmem>>, %arg10: memref<128x128xf32, #tpu.memory_space<vmem>>, %arg11: memref<1x128xf32, #tpu.memory_space<vmem>>, %arg12: memref<8x128xf32, #tpu.memory_space<vmem>>, %arg13: memref<8x128xf32, #tpu.memory_space<vmem>>) attributes {dimension_semantics = [], scalar_prefetch = 0 : i64, scratch_operands = 0 : i64, tpu.core_type = #tpu.core_type<tc>} {
    %c0 = arith.constant 0 : index
    %c0_0 = arith.constant 0 : index
    %0 = vector.load %arg0[%c0, %c0_0] : memref<8x128xf32, #tpu.memory_space<vmem>>, vector<8x128xf32>
    %c0_1 = arith.constant 0 : index
    %c0_2 = arith.constant 0 : index
    %1 = vector.load %arg1[%c0_1, %c0_2] : memref<128x128xf32, #tpu.memory_space<vmem>>, vector<128x128xf32>
    %cst = arith.constant dense<0.000000e+00> : vector<8x128xf32>
    %2 = tpu.matmul %0, %1, %cst {dimension_numbers = #tpu.dot_dimension_numbers<[1], [0], [0], [1], [0, 0, 1, 1], [], []>} : vector<8x128xf32>, vector<128x128xf32>, vector<8x128xf32> -> vector<8x128xf32>
    %c0_3 = arith.constant 0 : index
    %c0_4 = arith.constant 0 : index
    %3 = vector.load %arg3[%c0_3, %c0_4] : memref<1x128xf32, #tpu.memory_space<vmem>>, vector<1x128xf32>
    %4 = vector.broadcast %3 : vector<1x128xf32> to vector<8x128xf32>
    %5 = arith.addf %2, %4 : vector<8x128xf32>
    %6 = arith.mulf %0, %0 : vector<8x128xf32>
    %c0_5 = arith.constant 0 : index
    %c0_6 = arith.constant 0 : index
    %7 = vector.load %arg2[%c0_5, %c0_6] : memref<128x128xf32, #tpu.memory_space<vmem>>, vector<128x128xf32>
    %cst_7 = arith.constant dense<0.000000e+00> : vector<8x128xf32>
    %8 = tpu.matmul %6, %7, %cst_7 {dimension_numbers = #tpu.dot_dimension_numbers<[1], [0], [0], [1], [0, 0, 1, 1], [], []>} : vector<8x128xf32>, vector<128x128xf32>, vector<8x128xf32> -> vector<8x128xf32>
    %9 = math.sqrt %8 : vector<8x128xf32>
    %c0_8 = arith.constant 0 : index
    %c0_9 = arith.constant 0 : index
    %10 = vector.load %arg4[%c0_8, %c0_9] : memref<8x128xf32, #tpu.memory_space<vmem>>, vector<8x128xf32>
    %11 = arith.mulf %9, %10 : vector<8x128xf32>
    %12 = arith.addf %5, %11 : vector<8x128xf32>
    %cst_10 = arith.constant 0.000000e+00 : f32
    %13 = vector.broadcast %cst_10 : f32 to vector<8x128xf32>
    %14 = arith.maximumf %12, %13 : vector<8x128xf32>
    %c0_11 = arith.constant 0 : index
    %c0_12 = arith.constant 0 : index
    %15 = vector.load %arg5[%c0_11, %c0_12] : memref<128x128xf32, #tpu.memory_space<vmem>>, vector<128x128xf32>
    %cst_13 = arith.constant dense<0.000000e+00> : vector<8x128xf32>
    %16 = tpu.matmul %14, %15, %cst_13 {dimension_numbers = #tpu.dot_dimension_numbers<[1], [0], [0], [1], [0, 0, 1, 1], [], []>} : vector<8x128xf32>, vector<128x128xf32>, vector<8x128xf32> -> vector<8x128xf32>
    %c0_14 = arith.constant 0 : index
    %c0_15 = arith.constant 0 : index
    %17 = vector.load %arg7[%c0_14, %c0_15] : memref<1x128xf32, #tpu.memory_space<vmem>>, vector<1x128xf32>
    %18 = vector.broadcast %17 : vector<1x128xf32> to vector<8x128xf32>
    %19 = arith.addf %16, %18 : vector<8x128xf32>
    %20 = arith.mulf %14, %14 : vector<8x128xf32>
    %c0_16 = arith.constant 0 : index
    %c0_17 = arith.constant 0 : index
    %21 = vector.load %arg6[%c0_16, %c0_17] : memref<128x128xf32, #tpu.memory_space<vmem>>, vector<128x128xf32>
    %cst_18 = arith.constant dense<0.000000e+00> : vector<8x128xf32>
    %22 = tpu.matmul %20, %21, %cst_18 {dimension_numbers = #tpu.dot_dimension_numbers<[1], [0], [0], [1], [0, 0, 1, 1], [], []>} : vector<8x128xf32>, vector<128x128xf32>, vector<8x128xf32> -> vector<8x128xf32>
    %23 = math.sqrt %22 : vector<8x128xf32>
    %c0_19 = arith.constant 0 : index
    %c0_20 = arith.constant 0 : index
    %24 = vector.load %arg8[%c0_19, %c0_20] : memref<8x128xf32, #tpu.memory_space<vmem>>, vector<8x128xf32>
    %25 = arith.mulf %23, %24 : vector<8x128xf32>
    %26 = arith.addf %19, %25 : vector<8x128xf32>
    %cst_21 = arith.constant 0.000000e+00 : f32
    %27 = vector.broadcast %cst_21 : f32 to vector<8x128xf32>
    %28 = arith.maximumf %26, %27 : vector<8x128xf32>
    %c0_22 = arith.constant 0 : index
    %c0_23 = arith.constant 0 : index
    %29 = vector.load %arg9[%c0_22, %c0_23] : memref<128x128xf32, #tpu.memory_space<vmem>>, vector<128x128xf32>
    %cst_24 = arith.constant dense<0.000000e+00> : vector<8x128xf32>
    %30 = tpu.matmul %28, %29, %cst_24 {dimension_numbers = #tpu.dot_dimension_numbers<[1], [0], [0], [1], [0, 0, 1, 1], [], []>} : vector<8x128xf32>, vector<128x128xf32>, vector<8x128xf32> -> vector<8x128xf32>
    %c0_25 = arith.constant 0 : index
    %c0_26 = arith.constant 0 : index
    %31 = vector.load %arg11[%c0_25, %c0_26] : memref<1x128xf32, #tpu.memory_space<vmem>>, vector<1x128xf32>
    %32 = vector.broadcast %31 : vector<1x128xf32> to vector<8x128xf32>
    %33 = arith.addf %30, %32 : vector<8x128xf32>
    %34 = arith.mulf %28, %28 : vector<8x128xf32>
    %c0_27 = arith.constant 0 : index
    %c0_28 = arith.constant 0 : index
    %35 = vector.load %arg10[%c0_27, %c0_28] : memref<128x128xf32, #tpu.memory_space<vmem>>, vector<128x128xf32>
    %cst_29 = arith.constant dense<0.000000e+00> : vector<8x128xf32>
    %36 = tpu.matmul %34, %35, %cst_29 {dimension_numbers = #tpu.dot_dimension_numbers<[1], [0], [0], [1], [0, 0, 1, 1], [], []>} : vector<8x128xf32>, vector<128x128xf32>, vector<8x128xf32> -> vector<8x128xf32>
    %37 = math.sqrt %36 : vector<8x128xf32>
    %c0_30 = arith.constant 0 : index
    %c0_31 = arith.constant 0 : index
    %38 = vector.load %arg12[%c0_30, %c0_31] : memref<8x128xf32, #tpu.memory_space<vmem>>, vector<8x128xf32>
    %39 = arith.mulf %37, %38 : vector<8x128xf32>
    %40 = arith.addf %33, %39 : vector<8x128xf32>
    %c0_32 = arith.constant 0 : index
    %c0_33 = arith.constant 0 : index
    %41 = vector.load %arg13[%c0_32, %c0_33] : memref<8x128xf32, #tpu.memory_space<vmem>>, vector<8x128xf32>
    tpu.vector_store %arg13[%c0_32, %c0_33], %40 {strides = array<i32>} : memref<8x128xf32, #tpu.memory_space<vmem>>, vector<8x128xf32>,
    return
  }
}

</mosaic_0001>

<bundles_post_ra>
// kernel: bnn_forward.1
= control target key start
LH: loop header
LB: loop body
LE: loop exit
PB: predicated region body
PF: predicated region fallthrough
CT: control target
= control target key end

     0   :  { %s719_s2 = inlined_call_operand.vmem [shape: f32[128,128], index: 2, kind: input, shape index: {}]   ;;  %s720_s1 = inlined_call_operand.vmem [shape: f32[128,128], index: 1, kind: input, shape index: {}]   ;;  %s721_s5 = inlined_call_operand.vmem [shape: f32[128,128], index: 5, kind: input, shape index: {}]   ;;  %s722_s6 = inlined_call_operand.vmem [shape: f32[128,128], index: 6, kind: input, shape index: {}]   ;;  %s723_s0 = inlined_call_operand.vmem [shape: f32[8,128], index: 0, kind: input, shape index: {}]   ;;  %s724_s3 = inlined_call_operand.vmem [shape: f32[1,128], index: 3, kind: input, shape index: {}]   ;;  %s725_s7 = inlined_call_operand.vmem [shape: f32[1,128], index: 7, kind: input, shape index: {}]   ;;  %s726_s9 = inlined_call_operand.vmem [shape: f32[128,128], index: 9, kind: input, shape index: {}]   ;;  %s727_s4 = inlined_call_operand.vmem [shape: f32[8,128], index: 4, kind: input, shape index: {}]   ;;  %s728_s11 = inlined_call_operand.vmem [shape: f32[1,128], index: 11, kind: input, shape index: {}]   ;;  %s729_s10 = inlined_call_operand.vmem [shape: f32[128,128], index: 10, kind: input, shape index: {}]   ;;  %s730_s8 = inlined_call_operand.vmem [shape: f32[8,128], index: 8, kind: input, shape index: {}]   ;;  %s731_s12 = inlined_call_operand.vmem [shape: f32[8,128], index: 12, kind: input, shape index: {}]   ;;  %s732_s13 = inlined_call_operand.vmem [shape: f32[8,128], index: 13, kind: output, shape index: {}]  }
   0x1   :  { %v101_v0 = vld [vmem:[%s719_s2 + $0x78] sm:$0xff]  ;;  %v100_v1 = vld [vmem:[%s719_s2 + $0x70] sm:$0xff]  ;;  %v99_v2 = vld [vmem:[%s719_s2 + $0x68] sm:$0xff] }
   0x2   :  { %102 = vmatpush.msra.mxu1 %v101_v0  ;;  %v60_v3 = vld [vmem:[%s720_s1 + $0x78] sm:$0xff]  ;;  %v98_v4 = vld [vmem:[%s719_s2 + $0x60] sm:$0xff]  ;;  %v59_v5 = vld [vmem:[%s720_s1 + $0x70] sm:$0xff] }
   0x3   :  { %65 = vmatpush.msra.mxu0 %v60_v3  ;;  %v58_v6 = vld [vmem:[%s720_s1 + $0x68] sm:$0xff]  ;;  %v97_v7 = vld [vmem:[%s719_s2 + $0x58] sm:$0xff]  ;;  %v57_v8 = vld [vmem:[%s720_s1 + $0x60] sm:$0xff] }
   0x4   :  { %103 = vmatpush.msra.mxu1 %v100_v1  ;;  %v96_v9 = vld [vmem:[%s719_s2 + $0x50] sm:$0xff]  ;;  %v56_v10 = vld [vmem:[%s720_s1 + $0x58] sm:$0xff]  ;;  %v95_v11 = vld [vmem:[%s719_s2 + $0x48] sm:$0xff] }
   0x5   :  { %66 = vmatpush.msra.mxu0 %v59_v5  ;;  %v55_v12 = vld [vmem:[%s720_s1 + $0x50] sm:$0xff]  ;;  %v153_v13 = vld [vmem:[%s721_s5 + $0x78] sm:$0xff]  ;;  %v94_v16 = vld [vmem:[%s719_s2 + $0x40] sm:$0xff] }
   0x6   :  { %104 = vmatpush.msra.mxu1 %v99_v2  ;;  %v152_v14 = vld [vmem:[%s721_s5 + $0x70] sm:$0xff]  ;;  %v194_v15 = vld [vmem:[%s722_s6 + $0x78] sm:$0xff]  ;;  %158 = vmatpush.msra.mxu2 %v153_v13  ;;  %v54_v17 = vld [vmem:[%s720_s1 + $0x48] sm:$0xff] }
   0x7   :  { %67 = vmatpush.msra.mxu0 %v58_v6  ;;  %195 = vmatpush.msra.mxu3 %v194_v15  ;;  %v93_v18 = vld [vmem:[%s719_s2 + $0x38] sm:$0xff]  ;;  %v53_v19 = vld [vmem:[%s720_s1 + $0x40] sm:$0xff]  ;;  %v92_v20 = vld [vmem:[%s719_s2 + $0x30] sm:$0xff] }
   0x8   :  { %105 = vmatpush.msra.mxu1 %v98_v4  ;;  %159 = vmatpush.msra.mxu2 %v152_v14  ;;  %v52_v21 = vld [vmem:[%s720_s1 + $0x38] sm:$0xff]  ;;  %v91_v22 = vld [vmem:[%s719_s2 + $0x28] sm:$0xff]  ;;  %v51_v23 = vld [vmem:[%s720_s1 + $0x30] sm:$0xff] }
   0x9   :  { %68 = vmatpush.msra.mxu0 %v57_v8  ;;  %v90_v24 = vld [vmem:[%s719_s2 + $0x20] sm:$0xff]  ;;  %v50_v25 = vld [vmem:[%s720_s1 + $0x28] sm:$0xff]  ;;  %v89_v26 = vld [vmem:[%s719_s2 + $0x18] sm:$0xff] }
   0xa   :  { %106 = vmatpush.msra.mxu1 %v97_v7  ;;  %v49_v27 = vld [vmem:[%s720_s1 + $0x20] sm:$0xff]  ;;  %v88_v28 = vld [vmem:[%s719_s2 + $0x10] sm:$0xff]  ;;  %v48_v30 = vld [vmem:[%s720_s1 + $0x18] sm:$0xff] }
   0xb   :  { %69 = vmatpush.msra.mxu0 %v56_v10  ;;  %v44_v29 = vld [vmem:[%s723_s0] sm:$0xff]  ;;  %v87_v31 = vld [vmem:[%s719_s2 + $0x8] sm:$0xff]  ;;  %v47_v32 = vld [vmem:[%s720_s1 + $0x10] sm:$0xff] }
   0xc   :  { %107 = vmatpush.msra.mxu1 %v96_v9  ;;  %v86_v33 = vld [vmem:[%s719_s2] sm:$0xff]  ;;  %v85_v34 = vmul.f32 %v44_v29, %v44_v29  ;;  %v46_v35 = vld [vmem:[%s720_s1 + $0x8] sm:$0xff]  ;;  %v193_v38 = vld [vmem:[%s722_s6 + $0x70] sm:$0xff] }
   0xd   :  { %70 = vmatpush.msra.mxu0 %v55_v12  ;;  %v45_v36 = vld [vmem:[%s720_s1] sm:$0xff]  ;;  %v151_v37 = vld [vmem:[%s721_s5 + $0x68] sm:$0xff]  ;;  %196 = vmatpush.msra.mxu3 %v193_v38  ;;  %v149_v41 = vld [vmem:[%s721_s5 + $0x58] sm:$0xff] }
   0xe   :  { %108 = vmatpush.msra.mxu1 %v95_v11  ;;  %160 = vmatpush.msra.mxu2 %v151_v37  ;;  %v150_v39 = vld [vmem:[%s721_s5 + $0x60] sm:$0xff]  ;;  %v192_v40 = vld [vmem:[%s722_s6 + $0x68] sm:$0xff]  ;;  %v148_v43 = vld [vmem:[%s721_s5 + $0x50] sm:$0xff] }
   0xf   :  { %71 = vmatpush.msra.mxu0 %v54_v17  ;;  %197 = vmatpush.msra.mxu3 %v192_v40  ;;  %v191_v42 = vld [vmem:[%s722_s6 + $0x60] sm:$0xff]  ;;  %v190_v44 = vld [vmem:[%s722_s6 + $0x58] sm:$0xff]  ;;  %v147_v45 = vld [vmem:[%s721_s5 + $0x48] sm:$0xff] }
  0x10   :  { %109 = vmatpush.msra.mxu1 %v94_v16  ;;  %161 = vmatpush.msra.mxu2 %v150_v39  ;;  %v189_v46 = vld [vmem:[%s722_s6 + $0x50] sm:$0xff]  ;;  %v146_v47 = vld [vmem:[%s721_s5 + $0x40] sm:$0xff]  ;;  %v188_v48 = vld [vmem:[%s722_s6 + $0x48] sm:$0xff] }
  0x11   :  { %72 = vmatpush.msra.mxu0 %v53_v19  ;;  %198 = vmatpush.msra.mxu3 %v191_v42  ;;  %v145_v49 = vld [vmem:[%s721_s5 + $0x38] sm:$0xff]  ;;  %v187_v50 = vld [vmem:[%s722_s6 + $0x40] sm:$0xff]  ;;  %v144_v51 = vld [vmem:[%s721_s5 + $0x30] sm:$0xff] }
  0x12   :  { %110 = vmatpush.msra.mxu1 %v93_v18  ;;  %162 = vmatpush.msra.mxu2 %v149_v41  ;;  %v186_v52 = vld [vmem:[%s722_s6 + $0x38] sm:$0xff]  ;;  %v143_v53 = vld [vmem:[%s721_s5 + $0x28] sm:$0xff]  ;;  %v185_v54 = vld [vmem:[%s722_s6 + $0x30] sm:$0xff] }
  0x13   :  { %73 = vmatpush.msra.mxu0 %v52_v21  ;;  %199 = vmatpush.msra.mxu3 %v190_v44  ;;  %v142_v55 = vld [vmem:[%s721_s5 + $0x20] sm:$0xff]  ;;  %v184_v56 = vld [vmem:[%s722_s6 + $0x28] sm:$0xff]  ;;  %v141_v57 = vld [vmem:[%s721_s5 + $0x18] sm:$0xff] }
  0x14   :  { %111 = vmatpush.msra.mxu1 %v92_v20  ;;  %163 = vmatpush.msra.mxu2 %v148_v43  ;;  %v183_v58 = vld [vmem:[%s722_s6 + $0x20] sm:$0xff]  ;;  %v140_v59 = vld [vmem:[%s721_s5 + $0x10] sm:$0xff]  ;;  %v182_v60 = vld [vmem:[%s722_s6 + $0x18] sm:$0xff] }
  0x15   :  { %74 = vmatpush.msra.mxu0 %v51_v23  ;;  %200 = vmatpush.msra.mxu3 %v189_v46  ;;  %v139_v61 = vld [vmem:[%s721_s5 + $0x8] sm:$0xff]  ;;  %v181_v62 = vld [vmem:[%s722_s6 + $0x10] sm:$0xff]  ;;  %v138_v63 = vld [vmem:[%s721_s5] sm:$0xff] }
  0x16   :  { %112 = vmatpush.msra.mxu1 %v91_v22  ;;  %164 = vmatpush.msra.mxu2 %v147_v45  ;;  %v180_v0 = vld [vmem:[%s722_s6 + $0x8] sm:$0xff]  ;;  %v179_v1 = vld [vmem:[%s722_s6] sm:$0xff]  ;;  %v246_v2 = vld [vmem:[%s726_s9 + $0x78] sm:$0xff] }
  0x17   :  { %75 = vmatpush.msra.mxu0 %v50_v25  ;;  %201 = vmatpush.msra.mxu3 %v188_v48  ;;  %v328_v9 = vld [vmem:[%s724_s3] ss:$0 sm:$0xff]  ;;  %v245_v22 = vld [vmem:[%s726_s9 + $0x70] sm:$0xff]  ;;  %v287_v23 = vld [vmem:[%s729_s10 + $0x78] sm:$0xff] }
  0x18   :  { %113 = vmatpush.msra.mxu1 %v90_v24  ;;  %165 = vmatpush.msra.mxu2 %v146_v47  ;;  %v134_v14 = vld [vmem:[%s727_s4] sm:$0xff]  ;;  %v244_v24 = vld [vmem:[%s726_s9 + $0x68] sm:$0xff]  ;;  %v286_v25 = vld [vmem:[%s729_s10 + $0x70] sm:$0xff] }
  0x19   :  { %76 = vmatpush.msra.mxu0 %v49_v27  ;;  %202 = vmatpush.msra.mxu3 %v187_v50  ;;  %v285_v27 = vld [vmem:[%s729_s10 + $0x68] sm:$0xff]  ;;  %v280_v37 = vld [vmem:[%s729_s10 + $0x40] sm:$0xff]  ;;  %v237_v38 = vld [vmem:[%s726_s9 + $0x30] sm:$0xff] }
  0x1a   :  { %114 = vmatpush.msra.mxu1 %v89_v26  ;;  %166 = vmatpush.msra.mxu2 %v145_v49  ;;  %v243_v26 = vld [vmem:[%s726_s9 + $0x60] sm:$0xff]  ;;  %v279_v39 = vld [vmem:[%s729_s10 + $0x38] sm:$0xff]  ;;  %v236_v40 = vld [vmem:[%s726_s9 + $0x28] sm:$0xff] }
  0x1b   :  { %77 = vmatpush.msra.mxu0 %v48_v30  ;;  %203 = vmatpush.msra.mxu3 %v186_v52  ;;  %v241_v30 = vld [vmem:[%s726_s9 + $0x50] sm:$0xff]  ;;  %v235_v42 = vld [vmem:[%s726_s9 + $0x20] sm:$0xff]  ;;  %v277_v43 = vld [vmem:[%s729_s10 + $0x28] sm:$0xff] }
  0x1c   :  { %115 = vmatpush.msra.mxu1 %v88_v28  ;;  %167 = vmatpush.msra.mxu2 %v144_v51  ;;  %v242_v28 = vld [vmem:[%s726_s9 + $0x58] sm:$0xff]  ;;  %v278_v41 = vld [vmem:[%s729_s10 + $0x30] sm:$0xff]  ;;  %v276_v45 = vld [vmem:[%s729_s10 + $0x20] sm:$0xff] }
  0x1d   :  { %78 = vmatpush.msra.mxu0 %v47_v32  ;;  %204 = vmatpush.msra.mxu3 %v185_v54  ;;  %v240_v32 = vld [vmem:[%s726_s9 + $0x48] sm:$0xff]  ;;  %v234_v44 = vld [vmem:[%s726_s9 + $0x18] sm:$0xff]  ;;  %v233_v46 = vld [vmem:[%s726_s9 + $0x10] sm:$0xff] }
  0x1e   :  { %116 = vmatpush.msra.mxu1 %v87_v31  ;;  %168 = vmatpush.msra.mxu2 %v143_v53  ;;  %v283_v31 = vld [vmem:[%s729_s10 + $0x58] sm:$0xff]  ;;  %v232_v48 = vld [vmem:[%s726_s9 + $0x8] sm:$0xff]  ;;  %v274_v49 = vld [vmem:[%s729_s10 + $0x10] sm:$0xff] }
  0x1f   :  { %79 = vmatpush.msra.mxu0 %v46_v35  ;;  %205 = vmatpush.msra.mxu3 %v184_v56  ;;  %v281_v35 = vld [vmem:[%s729_s10 + $0x48] sm:$0xff]  ;;  %v275_v47 = vld [vmem:[%s729_s10 + $0x18] sm:$0xff]  ;;  %v231_v50 = vld [vmem:[%s726_s9] sm:$0xff] }
  0x20   :  { %117 = vmatpush.msra.mxu1 %v86_v33  ;;  %169 = vmatpush.msra.mxu2 %v142_v55  ;;  %v282_v33 = vld [vmem:[%s729_s10 + $0x50] sm:$0xff]  ;;  %v273_v51 = vld [vmem:[%s729_s10 + $0x8] sm:$0xff]  ;;  %v272_v52 = vld [vmem:[%s729_s10] sm:$0xff] }
  0x21   :  { %118 = vmatmul.f32.vlgmr.msra.gmra.mxu1 %v85_v34  ;;  %80 = vmatpush.msra.mxu0 %v45_v36  ;;  %v239_v34 = vld [vmem:[%s726_s9 + $0x40] sm:$0xff]  ;;  %v238_v36 = vld [vmem:[%s726_s9 + $0x38] sm:$0xff] }
  0x22   :  { %81 = vmatmul.f32.vlgmr.msra.gmra.mxu0 %v44_v29  ;;  %170 = vmatpush.msra.mxu2 %v141_v57  ;;  %v284_v29 = vld [vmem:[%s729_s10 + $0x60] sm:$0xff] }
  0x23   :  { %206 = vmatpush.msra.mxu3 %v183_v58  ;;  %251 = vmatpush.msrb.mxu0 %v246_v2 }
  0x24   :  { %171 = vmatpush.msra.mxu2 %v140_v59  ;;  %288 = vmatpush.msrb.mxu1 %v287_v23 }
  0x25   :  { %207 = vmatpush.msra.mxu3 %v182_v60  ;;  %252 = vmatpush.msrb.mxu0 %v245_v22  ;;  %v329_v60 = vld [vmem:[%s725_s7] ss:$0 sm:$0xff] }
  0x26   :  { %172 = vmatpush.msra.mxu2 %v139_v61  ;;  %289 = vmatpush.msrb.mxu1 %v286_v25 }
  0x27   :  { %208 = vmatpush.msra.mxu3 %v181_v62  ;;  %253 = vmatpush.msrb.mxu0 %v244_v24 }
  0x28   :  { %173 = vmatpush.msra.mxu2 %v138_v63  ;;  %290 = vmatpush.msrb.mxu1 %v285_v27 }
  0x29   :  { %209 = vmatpush.msra.mxu3 %v180_v0  ;;  %254 = vmatpush.msrb.mxu0 %v243_v26  ;;  %v227_v0 = vld [vmem:[%s730_s8] sm:$0xff] }
  0x2a   :  { %291 = vmatpush.msrb.mxu1 %v284_v29 }
  0x2b   :  { %210 = vmatpush.msra.mxu3 %v179_v1  ;;  %255 = vmatpush.msrb.mxu0 %v242_v28 }
  0x2c   :  { %292 = vmatpush.msrb.mxu1 %v283_v31 }
  0x2d   :  { %256 = vmatpush.msrb.mxu0 %v241_v30 }
  0x2e   :  { %293 = vmatpush.msrb.mxu1 %v282_v33 }
  0x2f   :  { %257 = vmatpush.msrb.mxu0 %v240_v32 }
  0x30   :  { %294 = vmatpush.msrb.mxu1 %v281_v35 }
  0x31   :  { %258 = vmatpush.msrb.mxu0 %v239_v34 }
  0x32   :  { %295 = vmatpush.msrb.mxu1 %v280_v37 }
  0x33   :  { %259 = vmatpush.msrb.mxu0 %v238_v36 }
  0x34   :  { %296 = vmatpush.msrb.mxu1 %v279_v39 }
  0x35   :  { %260 = vmatpush.msrb.mxu0 %v237_v38 }
  0x36   :  { %297 = vmatpush.msrb.mxu1 %v278_v41 }
  0x37   :  { %261 = vmatpush.msrb.mxu0 %v236_v40 }
  0x38   :  { %298 = vmatpush.msrb.mxu1 %v277_v43 }
  0x39   :  { %262 = vmatpush.msrb.mxu0 %v235_v42 }
  0x3a   :  { %299 = vmatpush.msrb.mxu1 %v276_v45 }
  0x3b   :  { %263 = vmatpush.msrb.mxu0 %v234_v44 }
  0x3c   :  { %300 = vmatpush.msrb.mxu1 %v275_v47 }
  0x3d   :  { %264 = vmatpush.msrb.mxu0 %v233_v46 }
  0x3e   :  { %301 = vmatpush.msrb.mxu1 %v274_v49 }
  0x3f   :  { %265 = vmatpush.msrb.mxu0 %v232_v48 }
  0x40   :  { %302 = vmatpush.msrb.mxu1 %v273_v51 }
  0x41   :  { %266 = vmatpush.msrb.mxu0 %v231_v50 }
  0x42   :  { %303 = vmatpush.msrb.mxu1 %v272_v52 }
  0x9e   :  { %v119_v3 = vpop.f32.mrf.mxu1 }
  0x9f   :  { %331 = vrsqrt.f32 %v119_v3  ;;  %v82_v11 = vpop.f32.mrf.mxu0  ;;  %vm129_vm0 = vcmp.eq.f32.partialorder %v119_v3, inf  ;;  %v132_v13 = vand.u32 2147483648, %v119_v3  ;;  %vm131_vm1 = vcmp.eq.f32.partialorder %v119_v3, 0.0 }
  0xa0   :  { %v83_v15 = vadd.f32 %v328_v9, %v82_v11 }
  0xa5   :  { %v332_v4 = vpop.eup %331 }
  0xa6   :  { %v123_v5 = vmul.f32 %v332_v4, %v119_v3 }
  0xa8   :  { %v124_v6 = vmul.f32 %v332_v4, %v123_v5 }
  0xaa   :  { %v125_v7 = vmul.f32 0.5, %v124_v6 }
  0xac   :  { %v126_v8 = vsub.f32 1.5, %v125_v7 }
  0xae   :  { %v127_v10 = vmul.f32 %v332_v4, %v126_v8 }
  0xb0   :  { %v128_v12 = vmul.f32 %v127_v10, %v119_v3 }
  0xb2   :  { %v130_v16 = vsel %vm129_vm0, %v119_v3, %v128_v12 }
  0xb3   :  { %v133_v17 = vsel %vm131_vm1, %v132_v13, %v130_v16 }
  0xb4   :  { %v135_v18 = vmul.f32 %v134_v14, %v133_v17 }
  0xb6   :  { %v136_v19 = vadd.f32 %v135_v18, %v83_v15  ;;  %v330_v15 = vld [vmem:[%s728_s11] ss:$0 sm:$0xff] }
  0xb8   :  { %v137_v20 = vmax.f32 %v136_v19, 0.0  ;;  %v320_v19 = vld [vmem:[%s731_s12] sm:$0xff] }
  0xba   :  { %174 = vmatmul.f32.vlgmr.msra.gmra.mxu2 %v137_v20  ;;  %v178_v21 = vmul.f32 %v137_v20, %v137_v20 }
  0xbc   :  { %211 = vmatmul.f32.vlgmr.msra.gmra.mxu3 %v178_v21 }
 0x13d   :  { %v175_v62 = vpop.f32.mrf.mxu2 }
 0x13e   :  { %v176_v3 = vadd.f32 %v329_v60, %v175_v62 }
 0x13f   :  { %v212_v53 = vpop.f32.mrf.mxu3 }
 0x140   :  { %333 = vrsqrt.f32 %v212_v53  ;;  %vm222_vm2 = vcmp.eq.f32.partialorder %v212_v53, inf  ;;  %v225_v63 = vand.u32 2147483648, %v212_v53  ;;  %vm224_vm3 = vcmp.eq.f32.partialorder %v212_v53, 0.0 }
 0x146   :  { %v334_v54 = vpop.eup %333 }
 0x147   :  { %v216_v55 = vmul.f32 %v334_v54, %v212_v53 }
 0x149   :  { %v217_v56 = vmul.f32 %v334_v54, %v216_v55 }
 0x14b   :  { %v218_v57 = vmul.f32 0.5, %v217_v56 }
 0x14d   :  { %v219_v58 = vsub.f32 1.5, %v218_v57 }
 0x14f   :  { %v220_v59 = vmul.f32 %v334_v54, %v219_v58 }
 0x151   :  { %v221_v61 = vmul.f32 %v220_v59, %v212_v53 }
 0x153   :  { %v223_v1 = vsel %vm222_vm2, %v212_v53, %v221_v61 }
 0x154   :  { %v226_v2 = vsel %vm224_vm3, %v225_v63, %v223_v1 }
 0x155   :  { %v228_v4 = vmul.f32 %v227_v0, %v226_v2 }
 0x157   :  { %v229_v5 = vadd.f32 %v228_v4, %v176_v3 }
 0x159   :  { %v230_v6 = vmax.f32 %v229_v5, 0.0 }
 0x15b   :  { %267 = vmatmul.f32.vlgmr.msrb.gmra.mxu0 %v230_v6  ;;  %v271_v7 = vmul.f32 %v230_v6, %v230_v6 }
 0x15d   :  { %304 = vmatmul.f32.vlgmr.msrb.gmra.mxu1 %v271_v7 }
 0x1d8   :  { %v268_v17 = vpop.f32.mrf.mxu0 }
 0x1d9   :  { %v269_v22 = vadd.f32 %v330_v15, %v268_v17 }
 0x1da   :  { %v305_v8 = vpop.f32.mrf.mxu1 }
 0x1db   :  { %335 = vrsqrt.f32 %v305_v8  ;;  %vm315_vm4 = vcmp.eq.f32.partialorder %v305_v8, inf  ;;  %v318_v18 = vand.u32 2147483648, %v305_v8  ;;  %vm317_vm5 = vcmp.eq.f32.partialorder %v305_v8, 0.0 }
 0x1e1   :  { %v336_v9 = vpop.eup %335 }
 0x1e2   :  { %v309_v10 = vmul.f32 %v336_v9, %v305_v8 }
 0x1e4   :  { %v310_v11 = vmul.f32 %v336_v9, %v309_v10 }
 0x1e6   :  { %v311_v12 = vmul.f32 0.5, %v310_v11 }
 0x1e8   :  { %v312_v13 = vsub.f32 1.5, %v311_v12 }
 0x1ea   :  { %v313_v14 = vmul.f32 %v336_v9, %v312_v13 }
 0x1ec   :  { %v314_v16 = vmul.f32 %v313_v14, %v305_v8 }
 0x1ee   :  { %v316_v20 = vsel %vm315_vm4, %v305_v8, %v314_v16 }
 0x1ef   :  { %v319_v21 = vsel %vm317_vm5, %v318_v18, %v316_v20 }
 0x1f0   :  { %v321_v23 = vmul.f32 %v320_v19, %v319_v21 }
 0x1f2   :  { %v322_v24 = vadd.f32 %v321_v23, %v269_v22 }
 0x1f4   :  { %323 = vst [vmem:[%s732_s13] sm:$0xff] %v322_v24 }

</bundles_post_ra>
